<compile_context>
chip_gen: v5e
topology: v5e:2x2
jax: 0.10.0
libtpu: 0.0.40
codegen_flags: <defaults>
</compile_context>

<pallas_src>
import functools

import jax
import jax.numpy as jnp
from jax.experimental import pallas as pl
from jax.experimental.pallas import tpu as pltpu

_MIB = 1024 * 1024


def _round_up(x, m):
    return ((x + m - 1) // m) * m


def _vmem_capacity_bytes():
    """Physical VMEM of the attached TPU; conservative (v7x) fallback."""
    try:
        cap = getattr(pltpu.get_tpu_info(), "vmem_capacity_bytes", None)
        if cap:
            return int(cap)
    except Exception:
        pass
    return 64 * _MIB


def _pick_batch_tile(B):
    """Largest divisor of B <= 8, preferring >= 2 batch grid steps so both v7x
    TensorCores get work ('parallel' axes shard across TCs)."""
    divs = [d for d in range(1, min(B, 8) + 1) if B % d == 0]
    two_steps = [d for d in divs if B // d >= 2]
    return max(two_steps) if two_steps else max(divs)


def _pick_hidden_tile(H, max_elems, want_split):
    """Multiple-of-128 divisor of H (lane-dense) fitting the budget, or the
    full H when H is small / not 128-aligned. Optionally split into >= 2 tiles
    for megacore when the batch axis has a single grid step."""
    if H % 128 != 0 or H <= 128:
        return H
    cands = [t for t in range(128, H + 1, 128) if H % t == 0]
    fits = [t for t in cands if t <= max_elems]
    th = max(fits) if fits else 128
    if want_split and th == H and (H // 2) % 128 == 0:
        th = H // 2
    return th


def _pick_seq_tile(S, max_elems):
    """Returns (TS, S_padded). TS is the full S or a multiple of 128 (hard
    layout requirement for the lane-dense (TB, 1, TS) mask block); if S has no
    suitable divisor, S is zero-padded up to a multiple of TS."""
    max_elems = max(int(max_elems), 128)
    if S <= max_elems:
        return S, S
    best = 0
    for t in range(128, max_elems + 1, 128):
        if S % t == 0:
            best = t
    if best:
        return best, S
    ts = max((max_elems // 128) * 128, 128)
    return ts, _round_up(S, ts)


def avg_pool_kernel(x_ref, mask_ref, o_ref, acc_ref, *, inv_seq_len):
    s = pl.program_id(2)

    # New sequence sweep for this (batch, hidden) tile: zero the accumulator.
    @pl.when(s == 0)
    def _():
        acc_ref[...] = jnp.zeros_like(acc_ref)

    x = x_ref[...]        # (TB, TS, TH)
    m = mask_ref[...]     # (TB, 1, TS), lane-dense 0/1 values
    # masked_fill(x, mask != 1, 0) + sum over S collapses to a single MXU
    # contraction for a 0/1 mask. f32 accumulation; HIGHEST precision so f32
    # inputs are not rounded through low-precision MXU passes.
    acc_ref[...] += jnp.einsum(
        "bqs,bsh->bqh", m, x,
        preferred_element_type=jnp.float32,
        precision=jax.lax.Precision.HIGHEST,
    )

    # Last sequence tile: apply the 1/S mean scale and write the output once.
    @pl.when(s == pl.num_programs(2) - 1)
    def _():
        o_ref[...] = (acc_ref[...] * inv_seq_len).astype(o_ref.dtype)


def avg_pooler_aggregator(input_tensors, mask=None, *, block_bytes=None):
    """input_tensors: (B, S, H); mask: (B, S) of {0, 1} (or None). -> (B, H)."""
    B, S, H = input_tensors.shape
    dtype = input_tensors.dtype
    itemsize = jnp.dtype(dtype).itemsize

    vmem_cap = _vmem_capacity_bytes()
    if block_bytes is None:
        # ~20 MiB x-blocks on 128 MiB parts (v5e/v6e), ~12 MiB on v7x (64 MiB).
        block_bytes = 20 * _MIB if vmem_cap >= 96 * _MIB else 12 * _MIB

    # ---- tile selection -----------------------------------------------------
    TB = _pick_batch_tile(B)
    want_split_h = (B // TB) < 2
    th_budget = max(block_bytes // (TB * 128 * itemsize), 128)
    TH = _pick_hidden_tile(H, th_budget, want_split_h)
    ts_budget = max(block_bytes // (TB * TH * itemsize), 128)
    TS, S_pad = _pick_seq_tile(S, ts_budget)

    grid = (B // TB, H // TH, S_pad // TS)

    # ---- operands -----------------------------------------------------------
    x = input_tensors
    mask2 = jnp.ones((B, S), dtype=dtype) if mask is None else mask.astype(dtype)
    mask3 = mask2.reshape(B, 1, S)          # lane-dense: S on the lane axis
    if S_pad != S:
        # Zero-pad the sequence axis; padded mask entries are 0 so the sum is
        # unchanged, and we still divide by the ORIGINAL S.
        x = jnp.pad(x, ((0, 0), (0, S_pad - S), (0, 0)))
        mask3 = jnp.pad(mask3, ((0, 0), (0, 0), (0, S_pad - S)))

    # ---- VMEM budget (double-buffered blocks + accumulator) -----------------
    x_blk = TB * _round_up(TS, 8) * _round_up(TH, 128) * itemsize
    m_blk = TB * 8 * _round_up(TS, 128) * itemsize
    o_blk = TB * 8 * _round_up(TH, 128) * itemsize
    acc_b = TB * 8 * _round_up(TH, 128) * 4
    needed = 2 * (x_blk + m_blk + o_blk) + acc_b
    vmem_limit = int(min(vmem_cap, max(needed + 4 * _MIB, 32 * _MIB)))

    kernel = functools.partial(avg_pool_kernel, inv_seq_len=1.0 / S)

    cost = pl.CostEstimate(
        flops=2 * B * S * H,
        transcendentals=0,
        bytes_accessed=(B * S * H + B * S + B * H) * itemsize,
    )

    out3 = pl.pallas_call(
        kernel,
        out_shape=jax.ShapeDtypeStruct((B, 1, H), dtype),
        grid_spec=pltpu.PrefetchScalarGridSpec(
            num_scalar_prefetch=0,
            grid=grid,
            in_specs=[
                pl.BlockSpec((TB, TS, TH), lambda b, h, s: (b, s, h)),
                pl.BlockSpec((TB, 1, TS), lambda b, h, s: (b, 0, s)),
            ],
            out_specs=pl.BlockSpec((TB, 1, TH), lambda b, h, s: (b, 0, h)),
            scratch_shapes=[pltpu.VMEM((TB, 1, TH), jnp.float32)],
        ),
        compiler_params=pltpu.CompilerParams(
            # Batch & hidden axes shard across TensorCores (v7x megacore); the
            # sequence axis carries the accumulator -> "arbitrary" and last.
            dimension_semantics=("parallel", "parallel", "arbitrary"),
            vmem_limit_bytes=vmem_limit,
        ),
        cost_estimate=cost,
    )(x, mask3)

    return out3.reshape(B, H)


def _reference(x, mask):
    return jnp.mean(jnp.where(mask[:, :, None] == 1.0, x, 0.0), axis=1)


if __name__ == "__main__":
    # Case 1: small shape matching the module's (batch, seq, hidden) layout.
    kx, km = jax.random.split(jax.random.PRNGKey(0))
    B, S, H = 2, 8, 32
    x = jax.random.normal(kx, (B, S, H), dtype=jnp.float32)
    mask = (jax.random.uniform(km, (B, S)) > 0.3).astype(jnp.float32)
    out = jax.block_until_ready(avg_pooler_aggregator(x, mask))
    assert out.shape == (B, H)
    assert jnp.allclose(out, _reference(x, mask), atol=1e-5, rtol=1e-5)

    # Case 2: multi-step pipeline (batch-parallel x sequence-accumulate) with a
    # small block budget to force TS < S and exercise the f32 accumulator.
    kx2, km2 = jax.random.split(jax.random.PRNGKey(1))
    B2, S2, H2 = 8, 256, 128
    x2 = jax.random.normal(kx2, (B2, S2, H2), dtype=jnp.float32)
    mask2 = (jax.random.uniform(km2, (B2, S2)) > 0.5).astype(jnp.float32)
    out2 = jax.block_until_ready(
        avg_pooler_aggregator(x2, mask2, block_bytes=256 * 1024))
    assert jnp.allclose(out2, _reference(x2, mask2), atol=1e-5, rtol=1e-5)

    # Case 3: awkward sequence length (no 128-multiple divisor) -> exercises
    # the zero-padding path; the mean still divides by the ORIGINAL S.
    kx3, km3 = jax.random.split(jax.random.PRNGKey(2))
    B3, S3, H3 = 3, 200, 64
    x3 = jax.random.normal(kx3, (B3, S3, H3), dtype=jnp.float32)
    mask3 = (jax.random.uniform(km3, (B3, S3)) > 0.4).astype(jnp.float32)
    out3 = jax.block_until_ready(
        avg_pooler_aggregator(x3, mask3, block_bytes=32 * 1024))
    assert jnp.allclose(out3, _reference(x3, mask3), atol=1e-5, rtol=1e-5)

    print("KERNEL_OK")
</pallas_src>

<mosaic_0001>
module attributes {stable_mosaic.version = 11 : i64} {
  func.func @avg_pool_kernel(%arg0: i32, %arg1: i32, %arg2: i32, %arg3: memref<1x8x32xf32, #tpu.memory_space<vmem>>, %arg4: memref<1x1x8xf32, #tpu.memory_space<vmem>>, %arg5: memref<1x1x32xf32, #tpu.memory_space<vmem>>, %arg6: memref<1x1x32xf32, #tpu.memory_space<vmem>>) attributes {dimension_semantics = [#tpu.dimension_semantics<parallel>, #tpu.dimension_semantics<parallel>, #tpu.dimension_semantics<arbitrary>], iteration_bounds = array<i64: 2, 1, 1>, scalar_prefetch = 0 : i64, scratch_operands = 1 : i64, tpu.core_type = #tpu.core_type<tc>, window_params = [{transform_indices = @transform_0, window_bounds = array<i64: 1, 8, 32>}, {transform_indices = @transform_1, window_bounds = array<i64: 1, 1, 8>}, {transform_indices = @transform_2, window_bounds = array<i64: 1, 1, 32>}]} {
    %c0_i32 = arith.constant 0 : i32
    %0 = arith.cmpi eq, %arg2, %c0_i32 : i32
    %1 = arith.extui %0 : i1 to i32
    %c0_i32_0 = arith.constant 0 : i32
    %2 = arith.cmpi ne, %1, %c0_i32_0 : i32
    scf.if %2 {
      %cst_14 = arith.constant 0.000000e+00 : f32
      %12 = vector.broadcast %cst_14 : f32 to vector<1x1x32xf32>
      %c0_15 = arith.constant 0 : index
      %c0_16 = arith.constant 0 : index
      %c0_17 = arith.constant 0 : index
      %13 = vector.load %arg6[%c0_15, %c0_16, %c0_17] : memref<1x1x32xf32, #tpu.memory_space<vmem>>, vector<1x1x32xf32>
      tpu.vector_store %arg6[%c0_15, %c0_16, %c0_17], %12 {strides = array<i32>} : memref<1x1x32xf32, #tpu.memory_space<vmem>>, vector<1x1x32xf32>,
    } else {
    }
    %c0 = arith.constant 0 : index
    %c0_1 = arith.constant 0 : index
    %c0_2 = arith.constant 0 : index
    %3 = vector.load %arg3[%c0, %c0_1, %c0_2] : memref<1x8x32xf32, #tpu.memory_space<vmem>>, vector<1x8x32xf32>
    %c0_3 = arith.constant 0 : index
    %c0_4 = arith.constant 0 : index
    %c0_5 = arith.constant 0 : index
    %4 = vector.load %arg4[%c0_3, %c0_4, %c0_5] : memref<1x1x8xf32, #tpu.memory_space<vmem>>, vector<1x1x8xf32>
    %c0_6 = arith.constant 0 : index
    %c0_7 = arith.constant 0 : index
    %c0_8 = arith.constant 0 : index
    %5 = vector.load %arg6[%c0_6, %c0_7, %c0_8] : memref<1x1x32xf32, #tpu.memory_space<vmem>>, vector<1x1x32xf32>
    "tpu.trace_start"() <{level = 10 : i32, message = "bqs,bsh->bqh"}> : () -> ()
    %cst = arith.constant dense<0.000000e+00> : vector<1x1x32xf32>
    %6 = tpu.matmul %4, %3, %cst {dimension_numbers = #tpu.dot_dimension_numbers<[2], [1], [1], [2], [0, 0, 0, 1, 1, 2], [0], [0]>, precision = #tpu.contract_precision<fp32>} : vector<1x1x8xf32>, vector<1x8x32xf32>, vector<1x1x32xf32> -> vector<1x1x32xf32>
    "tpu.trace_stop"() : () -> ()
    %7 = arith.addf %5, %6 : vector<1x1x32xf32>
    %c0_9 = arith.constant 0 : index
    %c0_10 = arith.constant 0 : index
    %c0_11 = arith.constant 0 : index
    %8 = vector.load %arg6[%c0_9, %c0_10, %c0_11] : memref<1x1x32xf32, #tpu.memory_space<vmem>>, vector<1x1x32xf32>
    tpu.vector_store %arg6[%c0_9, %c0_10, %c0_11], %7 {strides = array<i32>} : memref<1x1x32xf32, #tpu.memory_space<vmem>>, vector<1x1x32xf32>,
    %c0_i32_12 = arith.constant 0 : i32
    %9 = arith.cmpi eq, %arg2, %c0_i32_12 : i32
    %10 = arith.extui %9 : i1 to i32
    %c0_i32_13 = arith.constant 0 : i32
    %11 = arith.cmpi ne, %10, %c0_i32_13 : i32
    scf.if %11 {
      %c0_14 = arith.constant 0 : index
      %c0_15 = arith.constant 0 : index
      %c0_16 = arith.constant 0 : index
      %12 = vector.load %arg6[%c0_14, %c0_15, %c0_16] : memref<1x1x32xf32, #tpu.memory_space<vmem>>, vector<1x1x32xf32>
      %cst_17 = arith.constant 1.250000e-01 : f32
      %13 = vector.broadcast %cst_17 : f32 to vector<1x1x32xf32>
      %14 = arith.mulf %12, %13 : vector<1x1x32xf32>
      %c0_18 = arith.constant 0 : index
      %c0_19 = arith.constant 0 : index
      %c0_20 = arith.constant 0 : index
      %15 = vector.load %arg5[%c0_18, %c0_19, %c0_20] : memref<1x1x32xf32, #tpu.memory_space<vmem>>, vector<1x1x32xf32>
      tpu.vector_store %arg5[%c0_18, %c0_19, %c0_20], %14 {strides = array<i32>} : memref<1x1x32xf32, #tpu.memory_space<vmem>>, vector<1x1x32xf32>,
    } else {
    }
    return
  }
  func.func @transform_0(%arg0: i32, %arg1: i32, %arg2: i32) -> (i32, i32, i32) {
    %c0_i32 = arith.constant 0 : i32
    return %arg0, %arg2, %arg1 : i32, i32, i32
  }
  func.func @transform_1(%arg0: i32, %arg1: i32, %arg2: i32) -> (i32, i32, i32) {
    %c0_i32 = arith.constant 0 : i32
    %c0_i32_0 = arith.constant 0 : i32
    return %arg0, %c0_i32, %arg2 : i32, i32, i32
  }
  func.func @transform_2(%arg0: i32, %arg1: i32, %arg2: i32) -> (i32, i32, i32) {
    %c0_i32 = arith.constant 0 : i32
    %c0_i32_0 = arith.constant 0 : i32
    return %arg0, %c0_i32, %arg1 : i32, i32, i32
  }
}

</mosaic_0001>

<bundles_post_ra>
// kernel: tpu_custom_call.1
= control target key start
LH: loop header
LB: loop body
LE: loop exit
PB: predicated region body
PF: predicated region fallthrough
CT: control target
= control target key end

     0   :  { %7 = vsyncpa [#allocation4], 0  ;;  %s883_s0 = inlined_call_operand.hbm [shape: f32[2,8,32], index: 0, kind: input, shape index: {}]   ;;  %s884_s1 = inlined_call_operand.hbm [shape: f32[2,1,8], index: 1, kind: input, shape index: {}]   ;;  %s885_s2 = inlined_call_operand.hbm [shape: f32[2,1,32], index: 2, kind: output, shape index: {}]  }
   0x1   :  { %9 = vsyncpa [#allocation4 + $0x1], 0 }
   0x2   :  { %10 = vsyncpa [#allocation7], 0 }
   0x3   :  { %12 = vsyncpa [#allocation7 + $0x1], 0 }
   0x4   :  { %13 = vsyncpa [#allocation5], 0 }
   0x5   :  { %15 = vsyncpa [#allocation5 + $0x1], 0  ;;  %s749_s9 = smov 0   ;;  %s751_s10 = smov 0  }
   0x6   :  { %s753_s11 = smov 0   ;;  %s755_s12 = smov 0  }
   0x7   :  { %s757_s13 = smov 0   ;;  %s759_s14 = smov 0  }
   0x8 LB: > { %s507_s15 = sadd.s32 4294967295, %s731_s14   ;;  %s508_s16 = sadd.s32 4294967294, %s731_s14   ;;  %s731_s14 = sphi %s759_s14, %s21_s14   ;;  %s727_s13 = sphi %s757_s13, %s894_s13   ;;  %s723_s12 = sphi %s755_s12, %s893_s12   ;;  %s719_s11 = sphi %s753_s11, %s892_s11   ;;  %s715_s10 = sphi %s751_s10, %s891_s10   ;;  %s711_s9 = sphi %s749_s9, %s890_s9  }
   0x9   : > { %s40_s17 = sadd.s32 1, %s727_s13  ;;  %s51_s18 = sadd.s32 1, %s719_s11 }
   0xa   : > { %p42_p0 = scmp.ge.s32.totalorder %s40_s17, 2  ;;  %p58_p1 = scmp.ne.s32.totalorder %s719_s11, %s715_s10 }
   0xb   : > { %p59_p2 = scmp.eq.s32.totalorder %s731_s14, 0  ;;  %p64_p3 = scmp.ne.s32.totalorder %s715_s10, %s711_s9 }
   0xc   : > { %s896_s17 = smov (%p42_p0, %s40_s17), 0  ;;  %p65_p5 = scmp.eq.s32.totalorder %s507_s15, 0 }
   0xd   : > { %p790_p4 = por %p59_p2, %p58_p1  ;;  %s44_s20 = ssub.s32 %s727_s13, %s896_s17 }
   0xe   : > { %p118_p6 = scmp.eq.s32.totalorder %s507_s15, 1  ;;  %p49_p7 = scmp.eq.s32.totalorder %s44_s20, 0 }
   0xf   : > { %p796_p8 = por %p65_p5, %p64_p3  ;;  %p124_p10 = scmp.eq.s32.totalorder %s508_s16, 1 }
  0x10   : > { %p800_p9 = por %p118_p6, %p58_p1  ;;  %p510_p12 = scmp.ge.s32.totalorder %s731_s14, 2 }
  0x11   : > { %s805_s23 = scalar_select %p49_p7, %s719_s11, %s51_s18  }
  0x12   : > { %p807_p11 = por %p124_p10, %p64_p3  ;;  %p534_p13 = scmp.lt.s32.totalorder %s731_s14, 2 }
  0x13   : > { %s144_s25 = sand.u32 1, %s719_s11   ;;  %s512_s27 = sshll.u32 %s727_s13, 3 }
  0x14   : > { %s511_s26 = sshll.u32 %s144_s25, 3  ;;  %s154_s30 = scalar_lea.hbm %s883_s0, %s512_s27 }
  0x15   : > { %s148_s3 = scalar_lea.vmem [#allocation3], %s511_s26  ;;  %s156_s5 = sshll.u32 %s154_s30, 4  ;;  %s157_s5 = int_to_ptr.hbm [resolvable:$true] %s156_s5 }
  0x16   : > { %s158_s4 = sshll.u32 %s148_s3, 4  ;;  %p524_p0 = pnand %p534_p13, %p790_p4  ;;  %s159_s4 = int_to_ptr.vmem [resolvable:$true] %s158_s4 }
  0x17   : > { %p513_p1 = scmp.ge.s32.totalorder %s731_s14, 1  ;;  %p181_p2 = scmp.lt.s32.totalorder %s731_s14, 3 }
  0x18   : > { %s145_s6 = scalar_lea.sflag [#allocation4], %s144_s25  ;;  %s172_s15 = scalar_lea.hbm %s884_s1, %s727_s13 }
  0x19   : > { %526 = dma.hbm_to_vmem [thread:$0]  (!%p524_p0), %s157_s5, 128, %s159_s4, %s145_s6  }
  0x1a   : > { %p182_p3 = pnand %p513_p1, %p181_p2  ;;  %s168_s16 = scalar_lea.vmem [#allocation6], %s144_s25 }
  0x1b   : > { %s176_s18 = sshll.u32 %s168_s16, 4  ;;  %s174_s20 = sshll.u32 %s172_s15, 4  ;;  %s177_s18 = int_to_ptr.vmem [resolvable:$true] %s176_s18  ;;  %s175_s20 = int_to_ptr.hbm [resolvable:$true] %s174_s20 }
  0x1c   : > { %s166_s26 = scalar_lea.sflag [#allocation7], %s144_s25  ;;  %185 = sbr.rel (%p182_p3) target bundleno = 201 (0xc9), region = 28 }
  0x1d   : > { %529 = dma.hbm_to_vmem [thread:$0]  (!%p524_p0), %s175_s20, 16, %s177_s18, %s166_s26  }
  0x1e   : > { %s827_s19 = sand.u32 (!%p182_p3), 1, %s715_s10  }
  0x1f   : > { %s514_s27 = sshll.u32 (!%p182_p3), %s827_s19, 3  ;;  %s188_s28 = scalar_lea.sflag (!%p182_p3), [#allocation4], %s827_s19 }
  0x20   : > { %s191_s29 = scalar_lea.vmem (!%p182_p3), [#allocation3], %s514_s27 }
  0x21   : > { %698 = dma.done.wait (%p796_p8), %s188_s28, 128  }
  0x22   : > { %700 = vsyncadd (%p796_p8), %s188_s28, 4294967168  ;;  %s198_s25 = scalar_lea.sflag [#allocation7], %s827_s19  ;;  %s200_s30 = scalar_lea.vmem [#allocation6], %s827_s19 }
  0x23   : > { %702 = dma.done.wait (%p796_p8), %s198_s25, 16  }
  0x24   : > { %704 = vsyncadd (%p796_p8), %s198_s25, 4294967280  ;;  %vm234_vm0 = vcmask 64512   ;;  %v231_v0 = vld [vmem:[%s191_s29] sm:$0xff]  ;;  %v232_v1 = vld [vmem:[%s200_s30] sm:$0x1]  ;;  %vm229_vm1 = vcmask 253952   ;;  %s403_s4 = scalar_lea.hbm %s885_s2, %s723_s12 }
  0x25   : > { %v253_v2 = vand.u32 4294901760, %v231_v0  ;;  %v236_v3 = vsel %vm234_vm0, %v232_v1, 0  ;;  %v733_v13 = vmov 0.0   ;;  %s224_s5 = scalar_lea.vmem [#allocation8], %s827_s19  ;;  %s407_s7 = sshll.u32 %s403_s4, 4  ;;  %s408_s7 = int_to_ptr.hbm [resolvable:$true] %s407_s7 }
  0x26   : > { %v255_v4 = vand.u32 4294901760, %v236_v3  ;;  %230 = vst.msk [vmem:[#allocation2] sm:$0x1] %vm229_vm1, %v733_v13  ;;  %s405_s6 = sshll.u32 %s224_s5, 4  ;;  %s394_s8 = scalar_lea.sflag [#allocation5], %s827_s19  ;;  %s406_s6 = int_to_ptr.vmem [resolvable:$true] %s405_s6 }
  0x27   : > { %v280_v5 = vsub.f32 %v231_v0, %v253_v2  ;;  %330 = vmatpush.msra.mxu3 %v253_v2  ;;  %254 = vmatpush.msra.mxu0 %v253_v2  ;;  %s659_s15 = sshra.s32 %s408_s7, 4  ;;  %s665_s12 = scalar_lea.hbm %s885_s2, 2  ;;  %s660_s15 = int_to_ptr.hbm [resolvable:$true] %s659_s15 }
  0x28   : > { %v256_v6 = vsub.f32 %v236_v3, %v255_v4  ;;  %s661_s16 = scalar_lea.hbm %s660_s15, 1  ;;  %p666_p7 = scmp.lt.s32.totalorder %s660_s15, %s885_s2 }
  0x29   : > { %307 = vmatpush.msra.mxu2 %v280_v5  ;;  %v281_v7 = vand.u32 4294901760, %v280_v5  ;;  %p662_p4 = scmp.ne.s32.totalorder %s660_s15, %s661_s16  ;;  %p667_p8 = scmp.lt.s32.totalorder %s665_s12, %s661_s16 }
  0x2a   : > { %310 = vmatmul.f32.vlgmr.msra.gmra.mxu2 %v256_v6  ;;  %v257_v8 = vand.u32 4294901760, %v256_v6 }
  0x2b   : > { %v282_v9 = vsub.f32 %v280_v5, %v281_v7  ;;  %356 = vmatpush.msrb.mxu0 %v281_v7  ;;  %p663_p5 = pnand %p662_p4, %p800_p9  ;;  %p668_p10 = por %p667_p8, %p666_p7 }
  0x2c   : > { %334 = vmatmul.f32.vlgmr.msra.gmra.mxu3 %v257_v8  ;;  %v258_v10 = vsub.f32 %v256_v6, %v257_v8 }
  0x2d   : > { %v283_v11 = vand.u32 4294901760, %v282_v9  ;;  %v233_v24 = vld [vmem:[#allocation2] sm:$0x1]  ;;  %p664_p6 = pneg %p663_p5 }
  0x2e   : > { %v259_v12 = vand.u32 4294901760, %v258_v10 }
  0x2f   : > { %284 = vmatpush.msra.mxu1 %v283_v11  ;;  %p669_p13 = pnand %p668_p10, %p664_p6 }
  0x30   : > { %260 = vmatmul.f32.vlgmr.msra.gmra.mxu0 %v259_v12  ;;  %286 = vmatmul.f32.vlgmr.msra.gmra.mxu1 %v255_v4 }
  0x31   : > { %378 = vmatpush.msrb.mxu1 %v253_v2 }
  0x38   : > { %358 = vmatmul.f32.vlgmr.msrb.gmra.mxu0 %v255_v4  ;;  %380 = vmatmul.f32.vlgmr.msrb.gmra.mxu1 %v255_v4 }
  0xad   : > { %v261_v14 = vpop.f32.mrf.mxu0  ;;  %v287_v15 = vpop.f32.mrf.mxu1 }
  0xae   : > { %v288_v16 = vadd.f32 %v287_v15, %v261_v14  ;;  %v311_v17 = vpop.f32.mrf.mxu2 }
  0xaf   : > { %v335_v19 = vpop.f32.mrf.mxu3 }
  0xb0   : > { %v312_v18 = vadd.f32 %v311_v17, %v288_v16 }
  0xb2   : > { %v336_v20 = vadd.f32 %v335_v19, %v312_v18 }
  0xb5   : > { %v359_v21 = vpop.f32.mrf.mxu0  ;;  %v381_v22 = vpop.f32.mrf.mxu1 }
  0xb6   : > { %v360_v23 = vadd.f32 %v359_v21, %v336_v20 }
  0xb8   : > { %v382_v25 = vadd.f32 %v381_v22, %v360_v23 }
  0xba   : > { %v384_v26 = vadd.f32 %v382_v25, %v233_v24 }
  0xbc   : > { %386 = vst.msk [vmem:[#allocation2] sm:$0x1] %vm229_vm1, %v384_v26 }
  0xc3   : > { %v390_v27 = vld [vmem:[#allocation2] sm:$0x1] }
  0xc4   : > { %v391_v28 = vmul.f32 0.125, %v390_v27 }
  0xc6   : > { %392 = vst.msk [vmem:[%s224_s5] sm:$0x1] %vm229_vm1, %v391_v28 }
  0xc7   : > { %672 = shalt.err (!%p669_p13)
}
  0xc8   : > { %521 = dma.vmem_to_hbm [thread:$0]  (%p800_p9), %s406_s6, 16, %s408_s7, %s394_s8  }
  0xc9 PF: > { %s419_s19 = sand.u32 1, %s711_s9   ;;  %p531_p0 = pnand %p510_p12, %p807_p11 }
  0xca   : > { %s420_s28 = scalar_lea.sflag [#allocation5], %s419_s19 }
  0xcb   : > { %p532_p1 = pneg %p531_p0 }
  0xcd   : > { %706 = dma.done.wait (%p532_p1), %s420_s28, 16  }
  0xce   : > { %708 = vsyncadd (%p532_p1), %s420_s28, 4294967280  ;;  %s21_s14 = sadd.s32 1, %s731_s14   ;;  %s890_s9 = smov %s715_s10 }
  0xcf   : > { %p18_p2 = scmp.ge.s32.totalorder %s21_s14, 4   ;;  %s891_s10 = smov %s719_s11 }
  0xd0   : > { %s892_s11 = smov %s805_s23  ;;  %s893_s12 = smov %s727_s13 }
  0xd1   : > { %s894_s13 = smov %s896_s17  ;;  %20 = sbr.rel (!%p18_p2) target bundleno = 8 (0x8), region = 94 }
  0xd6   :  { %425 = vsyncpa [#allocation4], 1 }
  0xd7   :  { %427 = vsyncpa [#allocation4 + $0x1], 1 }
  0xd8   :  { %428 = vsyncpa [#allocation7], 1 }
  0xd9   :  { %430 = vsyncpa [#allocation7 + $0x1], 1 }
  0xda   :  { %431 = vsyncpa [#allocation5], 1 }
  0xdb   :  { %433 = vsyncpa [#allocation5 + $0x1], 1 }

</bundles_post_ra>
